<compile_context>
chip_gen: v7x
topology: tpu7x:2x2x1
jax: 0.10.0
libtpu: 0.0.40
codegen_flags: <defaults>
</compile_context>

<pallas_src>
import functools

import jax
import jax.numpy as jnp
from jax.experimental import pallas as pl
from jax.experimental.pallas import tpu as pltpu


def _round_up(n, m):
    return ((n + m - 1) // m) * m


def _pi_net_kernel(x_ref, w1_ref, b1_ref, w2_ref, b2_ref, w3_ref, b3_ref,
                   wmu_ref, bmu_ref, wsig_ref, bsig_ref, mu_ref, sigma_ref):
    x = x_ref[...]                                   # (TB, 3) f32

    # ---- Layer 1 on the VPU (K=3 would waste >97% of the systolic array) ----
    w1 = w1_ref[...]                                 # (3, 64)
    h1 = (x[:, 0:1] * w1[0:1, :]
          + x[:, 1:2] * w1[1:2, :]
          + x[:, 2:3] * w1[2:3, :]
          + b1_ref[...])                             # (TB, 64)
    h1 = jnp.maximum(h1, 0.0)

    # ---- Layers 2/3 on the MXU: (bf16|f32) inputs, f32 accumulation ----
    h2 = jnp.dot(h1.astype(w2_ref.dtype), w2_ref[...],
                 preferred_element_type=jnp.float32) + b2_ref[...]   # (TB, 128)
    h2 = jnp.maximum(h2, 0.0)

    h3 = jnp.dot(h2.astype(w3_ref.dtype), w3_ref[...],
                 preferred_element_type=jnp.float32) + b3_ref[...]   # (TB, 256)
    h3 = jnp.maximum(h3, 0.0)

    # ---- Heads on VPU + XLU lane-reduce (N=1 matmul would use 1/256 of MXU) ----
    mu_lin = jnp.sum(h3 * wmu_ref[...], axis=-1, keepdims=True) + bmu_ref[...]
    sig_lin = jnp.sum(h3 * wsig_ref[...], axis=-1, keepdims=True) + bsig_ref[...]

    mu_ref[...] = (jnp.tanh(mu_lin) * 2.0).astype(mu_ref.dtype)
    # numerically-stable softplus
    softplus = jnp.maximum(sig_lin, 0.0) + jnp.log1p(jnp.exp(-jnp.abs(sig_lin)))
    sigma_ref[...] = (softplus + 0.001).astype(sigma_ref.dtype)


def pi_net_forward(x, params, *, block_b=512, use_bf16=True):
    """x: (B, 3) float32. Returns (mu, sigma), each (B, 1) float32."""
    B = x.shape[0]

    # Batch tile: multiple of 8 (sublane), capped at block_b (sized well within
    # v7x's 32 MiB scoped VMEM: activations ~ TB * 1.75 KiB + ~166 KiB weights).
    TB = min(block_b, _round_up(B, 8))
    Bp = _round_up(B, TB)
    if Bp != B:
        x = jnp.pad(x, ((0, Bp - B), (0, 0)))
    grid = (Bp // TB,)

    wdtype = jnp.bfloat16 if use_bf16 else jnp.float32
    w1, b1 = params["w1"], params["b1"]
    w2, b2 = params["w2"].astype(wdtype), params["b2"]
    w3, b3 = params["w3"].astype(wdtype), params["b3"]
    wmu, bmu = params["w_mu"], params["b_mu"]
    wsig, bsig = params["w_sigma"], params["b_sigma"]

    # Weights/biases: full-shape blocks with a constant index_map -> VMEM-resident
    # across all grid iterations (no re-DMA per step).
    resident = lambda a: pl.BlockSpec(a.shape, lambda i: (0,) * a.ndim)

    flops = 2 * Bp * (3 * 64 + 64 * 128 + 128 * 256 + 2 * 256)
    weight_bytes = sum(int(a.size) * a.dtype.itemsize
                       for a in (w1, b1, w2, b2, w3, b3, wmu, bmu, wsig, bsig))
    bytes_accessed = Bp * 3 * 4 + 2 * Bp * 4 + weight_bytes

    mu, sigma = pl.pallas_call(
        _pi_net_kernel,
        out_shape=(jax.ShapeDtypeStruct((Bp, 1), jnp.float32),
                   jax.ShapeDtypeStruct((Bp, 1), jnp.float32)),
        grid=grid,
        in_specs=[
            pl.BlockSpec((TB, 3), lambda i: (i, 0)),        # x tile (pipelined)
            resident(w1), resident(b1),
            resident(w2), resident(b2),
            resident(w3), resident(b3),
            resident(wmu), resident(bmu),
            resident(wsig), resident(bsig),
        ],
        out_specs=(pl.BlockSpec((TB, 1), lambda i: (i, 0)),
                   pl.BlockSpec((TB, 1), lambda i: (i, 0))),
        compiler_params=pltpu.CompilerParams(
            dimension_semantics=("parallel",),              # megacore on v7x
            vmem_limit_bytes=32 * 1024 * 1024,              # portable v5e/v6e/v7x
        ),
        cost_estimate=pl.CostEstimate(
            flops=flops, transcendentals=3 * Bp, bytes_accessed=bytes_accessed),
    )(x, w1, b1, w2, b2, w3, b3, wmu, bmu, wsig, bsig)

    return mu[:B], sigma[:B]


def init_params(key):
    """PyTorch-Linear-style init (uniform +-1/sqrt(fan_in)).
    Hidden weights stored as (in_features, out_features) == PyTorch weight.T;
    head weights stored as (1, 256) rows (== PyTorch's (out, in) shape)."""
    params = {}
    keys = jax.random.split(key, 10)

    hidden = [("w1", "b1", 3, 64), ("w2", "b2", 64, 128), ("w3", "b3", 128, 256)]
    k = 0
    for wname, bname, fan_in, fan_out in hidden:
        bound = 1.0 / jnp.sqrt(float(fan_in))
        params[wname] = jax.random.uniform(
            keys[k], (fan_in, fan_out), jnp.float32, -bound, bound)
        params[bname] = jax.random.uniform(
            keys[k + 1], (1, fan_out), jnp.float32, -bound, bound)
        k += 2

    bound = 1.0 / jnp.sqrt(256.0)
    for hname in ("mu", "sigma"):
        params[f"w_{hname}"] = jax.random.uniform(
            keys[k], (1, 256), jnp.float32, -bound, bound)
        params[f"b_{hname}"] = jax.random.uniform(
            keys[k + 1], (1, 1), jnp.float32, -bound, bound)
        k += 2
    return params


def pi_net_reference(x, params):
    """Pure-f32 JAX mirror of the PyTorch forward."""
    h = x
    for i in range(1, 4):
        h = jnp.maximum(h @ params[f"w{i}"] + params[f"b{i}"], 0.0)
    mu_lin = h @ params["w_mu"].T + params["b_mu"]
    sig_lin = h @ params["w_sigma"].T + params["b_sigma"]
    mu = jnp.tanh(mu_lin) * 2.0
    sigma = jax.nn.softplus(sig_lin) + 0.001
    return mu, sigma


if __name__ == "__main__":
    key = jax.random.PRNGKey(0)
    pkey, xkey, xkey2 = jax.random.split(key, 3)
    params = init_params(pkey)

    # --- Small test: f32 path, tight tolerance ---
    B = 8
    x = jax.random.normal(xkey, (B, 3), jnp.float32)
    mu_ref, sigma_ref = pi_net_reference(x, params)

    mu_f32, sigma_f32 = pi_net_forward(x, params, use_bf16=False)
    jax.block_until_ready((mu_f32, sigma_f32))
    assert mu_f32.shape == (B, 1) and sigma_f32.shape == (B, 1)
    assert jnp.allclose(mu_f32, mu_ref, atol=1e-5, rtol=1e-5)
    assert jnp.allclose(sigma_f32, sigma_ref, atol=1e-5, rtol=1e-5)

    # --- Optimized bf16-matmul path (looser tolerance for bf16 MXU inputs) ---
    mu_bf, sigma_bf = pi_net_forward(x, params, use_bf16=True)
    jax.block_until_ready((mu_bf, sigma_bf))
    assert jnp.allclose(mu_bf, mu_ref, atol=2e-2, rtol=2e-2)
    assert jnp.allclose(sigma_bf, sigma_ref, atol=2e-2, rtol=2e-2)

    # --- Exercise the batch grid + padding (B not a multiple of the tile) ---
    B2 = 37
    x2 = jax.random.normal(xkey2, (B2, 3), jnp.float32)
    mu2_ref, sigma2_ref = pi_net_reference(x2, params)
    mu2, sigma2 = pi_net_forward(x2, params, block_b=8, use_bf16=False)
    jax.block_until_ready((mu2, sigma2))
    assert mu2.shape == (B2, 1) and sigma2.shape == (B2, 1)
    assert jnp.allclose(mu2, mu2_ref, atol=1e-5, rtol=1e-5)
    assert jnp.allclose(sigma2, sigma2_ref, atol=1e-5, rtol=1e-5)

    print("KERNEL_OK")
</pallas_src>

<mosaic_0001>
module attributes {stable_mosaic.version = 11 : i64} {
  func.func @_pi_net_kernel(%arg0: i32, %arg1: memref<8x3xf32, #tpu.memory_space<vmem>>, %arg2: memref<3x64xf32, #tpu.memory_space<vmem>>, %arg3: memref<1x64xf32, #tpu.memory_space<vmem>>, %arg4: memref<64x128xf32, #tpu.memory_space<vmem>>, %arg5: memref<1x128xf32, #tpu.memory_space<vmem>>, %arg6: memref<128x256xf32, #tpu.memory_space<vmem>>, %arg7: memref<1x256xf32, #tpu.memory_space<vmem>>, %arg8: memref<1x256xf32, #tpu.memory_space<vmem>>, %arg9: memref<1x1xf32, #tpu.memory_space<vmem>>, %arg10: memref<1x256xf32, #tpu.memory_space<vmem>>, %arg11: memref<1x1xf32, #tpu.memory_space<vmem>>, %arg12: memref<8x1xf32, #tpu.memory_space<vmem>>, %arg13: memref<8x1xf32, #tpu.memory_space<vmem>>) attributes {dimension_semantics = [#tpu.dimension_semantics<parallel>], iteration_bounds = array<i64: 1>, scalar_prefetch = 0 : i64, scratch_operands = 0 : i64, tpu.core_type = #tpu.core_type<tc>, window_params = [{transform_indices = @transform_0, window_bounds = array<i64: 8, 3>}, {pipeline_mode = #tpu.pipeline_mode<synchronous>, transform_indices = @transform_1, window_bounds = array<i64: 3, 64>}, {pipeline_mode = #tpu.pipeline_mode<synchronous>, transform_indices = @transform_2, window_bounds = array<i64: 1, 64>}, {pipeline_mode = #tpu.pipeline_mode<synchronous>, transform_indices = @transform_3, window_bounds = array<i64: 64, 128>}, {pipeline_mode = #tpu.pipeline_mode<synchronous>, transform_indices = @transform_4, window_bounds = array<i64: 1, 128>}, {pipeline_mode = #tpu.pipeline_mode<synchronous>, transform_indices = @transform_5, window_bounds = array<i64: 128, 256>}, {pipeline_mode = #tpu.pipeline_mode<synchronous>, transform_indices = @transform_6, window_bounds = array<i64: 1, 256>}, {pipeline_mode = #tpu.pipeline_mode<synchronous>, transform_indices = @transform_7, window_bounds = array<i64: 1, 256>}, {pipeline_mode = #tpu.pipeline_mode<synchronous>, transform_indices = @transform_8, window_bounds = array<i64: 1, 1>}, {pipeline_mode = #tpu.pipeline_mode<synchronous>, transform_indices = @transform_9, window_bounds = array<i64: 1, 256>}, {pipeline_mode = #tpu.pipeline_mode<synchronous>, transform_indices = @transform_10, window_bounds = array<i64: 1, 1>}, {transform_indices = @transform_11, window_bounds = array<i64: 8, 1>}, {transform_indices = @transform_12, window_bounds = array<i64: 8, 1>}]} {
    %c0 = arith.constant 0 : index
    %c0_0 = arith.constant 0 : index
    %0 = vector.load %arg1[%c0, %c0_0] : memref<8x3xf32, #tpu.memory_space<vmem>>, vector<8x3xf32>
    %c0_1 = arith.constant 0 : index
    %c0_2 = arith.constant 0 : index
    %1 = vector.load %arg2[%c0_1, %c0_2] : memref<3x64xf32, #tpu.memory_space<vmem>>, vector<3x64xf32>
    %2 = vector.extract_strided_slice %0 {offsets = [0, 0], sizes = [8, 1], strides = [1, 1]} : vector<8x3xf32> to vector<8x1xf32>
    %3 = vector.extract_strided_slice %1 {offsets = [0, 0], sizes = [1, 64], strides = [1, 1]} : vector<3x64xf32> to vector<1x64xf32>
    %4 = vector.broadcast %2 : vector<8x1xf32> to vector<8x64xf32>
    %5 = vector.broadcast %3 : vector<1x64xf32> to vector<8x64xf32>
    %6 = arith.mulf %4, %5 : vector<8x64xf32>
    %7 = vector.extract_strided_slice %0 {offsets = [0, 1], sizes = [8, 1], strides = [1, 1]} : vector<8x3xf32> to vector<8x1xf32>
    %8 = vector.extract_strided_slice %1 {offsets = [1, 0], sizes = [1, 64], strides = [1, 1]} : vector<3x64xf32> to vector<1x64xf32>
    %9 = vector.broadcast %7 : vector<8x1xf32> to vector<8x64xf32>
    %10 = vector.broadcast %8 : vector<1x64xf32> to vector<8x64xf32>
    %11 = arith.mulf %9, %10 : vector<8x64xf32>
    %12 = arith.addf %6, %11 : vector<8x64xf32>
    %13 = vector.extract_strided_slice %0 {offsets = [0, 2], sizes = [8, 1], strides = [1, 1]} : vector<8x3xf32> to vector<8x1xf32>
    %14 = vector.extract_strided_slice %1 {offsets = [2, 0], sizes = [1, 64], strides = [1, 1]} : vector<3x64xf32> to vector<1x64xf32>
    %15 = vector.broadcast %13 : vector<8x1xf32> to vector<8x64xf32>
    %16 = vector.broadcast %14 : vector<1x64xf32> to vector<8x64xf32>
    %17 = arith.mulf %15, %16 : vector<8x64xf32>
    %18 = arith.addf %12, %17 : vector<8x64xf32>
    %c0_3 = arith.constant 0 : index
    %c0_4 = arith.constant 0 : index
    %19 = vector.load %arg3[%c0_3, %c0_4] : memref<1x64xf32, #tpu.memory_space<vmem>>, vector<1x64xf32>
    %20 = vector.broadcast %19 : vector<1x64xf32> to vector<8x64xf32>
    %21 = arith.addf %18, %20 : vector<8x64xf32>
    %cst = arith.constant 0.000000e+00 : f32
    %22 = vector.broadcast %cst : f32 to vector<8x64xf32>
    %23 = arith.maximumf %21, %22 : vector<8x64xf32>
    %c0_5 = arith.constant 0 : index
    %c0_6 = arith.constant 0 : index
    %24 = vector.load %arg4[%c0_5, %c0_6] : memref<64x128xf32, #tpu.memory_space<vmem>>, vector<64x128xf32>
    %cst_7 = arith.constant dense<0.000000e+00> : vector<8x128xf32>
    %25 = tpu.matmul %23, %24, %cst_7 {dimension_numbers = #tpu.dot_dimension_numbers<[1], [0], [0], [1], [0, 0, 1, 1], [], []>} : vector<8x64xf32>, vector<64x128xf32>, vector<8x128xf32> -> vector<8x128xf32>
    %c0_8 = arith.constant 0 : index
    %c0_9 = arith.constant 0 : index
    %26 = vector.load %arg5[%c0_8, %c0_9] : memref<1x128xf32, #tpu.memory_space<vmem>>, vector<1x128xf32>
    %27 = vector.broadcast %26 : vector<1x128xf32> to vector<8x128xf32>
    %28 = arith.addf %25, %27 : vector<8x128xf32>
    %cst_10 = arith.constant 0.000000e+00 : f32
    %29 = vector.broadcast %cst_10 : f32 to vector<8x128xf32>
    %30 = arith.maximumf %28, %29 : vector<8x128xf32>
    %c0_11 = arith.constant 0 : index
    %c0_12 = arith.constant 0 : index
    %31 = vector.load %arg6[%c0_11, %c0_12] : memref<128x256xf32, #tpu.memory_space<vmem>>, vector<128x256xf32>
    %cst_13 = arith.constant dense<0.000000e+00> : vector<8x256xf32>
    %32 = tpu.matmul %30, %31, %cst_13 {dimension_numbers = #tpu.dot_dimension_numbers<[1], [0], [0], [1], [0, 0, 1, 1], [], []>} : vector<8x128xf32>, vector<128x256xf32>, vector<8x256xf32> -> vector<8x256xf32>
    %c0_14 = arith.constant 0 : index
    %c0_15 = arith.constant 0 : index
    %33 = vector.load %arg7[%c0_14, %c0_15] : memref<1x256xf32, #tpu.memory_space<vmem>>, vector<1x256xf32>
    %34 = vector.broadcast %33 : vector<1x256xf32> to vector<8x256xf32>
    %35 = arith.addf %32, %34 : vector<8x256xf32>
    %cst_16 = arith.constant 0.000000e+00 : f32
    %36 = vector.broadcast %cst_16 : f32 to vector<8x256xf32>
    %37 = arith.maximumf %35, %36 : vector<8x256xf32>
    %c0_17 = arith.constant 0 : index
    %c0_18 = arith.constant 0 : index
    %38 = vector.load %arg8[%c0_17, %c0_18] : memref<1x256xf32, #tpu.memory_space<vmem>>, vector<1x256xf32>
    %39 = vector.broadcast %38 : vector<1x256xf32> to vector<8x256xf32>
    %40 = arith.mulf %37, %39 : vector<8x256xf32>
    %cst_19 = arith.constant dense<0.000000e+00> : vector<8xf32>
    %41 = vector.multi_reduction <add>, %40, %cst_19 [1] : vector<8x256xf32> to vector<8xf32>
    %42 = vector.shape_cast %41 : vector<8xf32> to vector<8x1xf32>
    %c0_20 = arith.constant 0 : index
    %c0_21 = arith.constant 0 : index
    %43 = vector.load %arg9[%c0_20, %c0_21] : memref<1x1xf32, #tpu.memory_space<vmem>>, vector<1x1xf32>
    %44 = vector.broadcast %43 : vector<1x1xf32> to vector<8x1xf32>
    %45 = arith.addf %42, %44 : vector<8x1xf32>
    %c0_22 = arith.constant 0 : index
    %c0_23 = arith.constant 0 : index
    %46 = vector.load %arg10[%c0_22, %c0_23] : memref<1x256xf32, #tpu.memory_space<vmem>>, vector<1x256xf32>
    %47 = vector.broadcast %46 : vector<1x256xf32> to vector<8x256xf32>
    %48 = arith.mulf %37, %47 : vector<8x256xf32>
    %cst_24 = arith.constant dense<0.000000e+00> : vector<8xf32>
    %49 = vector.multi_reduction <add>, %48, %cst_24 [1] : vector<8x256xf32> to vector<8xf32>
    %50 = vector.shape_cast %49 : vector<8xf32> to vector<8x1xf32>
    %c0_25 = arith.constant 0 : index
    %c0_26 = arith.constant 0 : index
    %51 = vector.load %arg11[%c0_25, %c0_26] : memref<1x1xf32, #tpu.memory_space<vmem>>, vector<1x1xf32>
    %52 = vector.broadcast %51 : vector<1x1xf32> to vector<8x1xf32>
    %53 = arith.addf %50, %52 : vector<8x1xf32>
    %54 = math.tanh %45 : vector<8x1xf32>
    %cst_27 = arith.constant 2.000000e+00 : f32
    %55 = vector.broadcast %cst_27 : f32 to vector<8x1xf32>
    %56 = arith.mulf %54, %55 : vector<8x1xf32>
    %c0_28 = arith.constant 0 : index
    %c0_29 = arith.constant 0 : index
    %57 = vector.load %arg12[%c0_28, %c0_29] : memref<8x1xf32, #tpu.memory_space<vmem>>, vector<8x1xf32>
    tpu.vector_store %arg12[%c0_28, %c0_29], %56 {strides = array<i32>} : memref<8x1xf32, #tpu.memory_space<vmem>>, vector<8x1xf32>,
    %cst_30 = arith.constant 0.000000e+00 : f32
    %58 = vector.broadcast %cst_30 : f32 to vector<8x1xf32>
    %59 = arith.maximumf %53, %58 : vector<8x1xf32>
    %60 = math.absf %53 : vector<8x1xf32>
    %cst_31 = arith.constant 0.000000e+00 : f32
    %61 = vector.broadcast %cst_31 : f32 to vector<8x1xf32>
    %62 = arith.subf %61, %60 : vector<8x1xf32>
    %63 = math.exp %62 : vector<8x1xf32>
    %64 = math.log1p %63 : vector<8x1xf32>
    %65 = arith.addf %59, %64 : vector<8x1xf32>
    %cst_32 = arith.constant 1.000000e-03 : f32
    %66 = vector.broadcast %cst_32 : f32 to vector<8x1xf32>
    %67 = arith.addf %65, %66 : vector<8x1xf32>
    %c0_33 = arith.constant 0 : index
    %c0_34 = arith.constant 0 : index
    %68 = vector.load %arg13[%c0_33, %c0_34] : memref<8x1xf32, #tpu.memory_space<vmem>>, vector<8x1xf32>
    tpu.vector_store %arg13[%c0_33, %c0_34], %67 {strides = array<i32>} : memref<8x1xf32, #tpu.memory_space<vmem>>, vector<8x1xf32>,
    return
  }
  func.func @transform_0(%arg0: i32) -> (i32, i32) {
    %c0_i32 = arith.constant 0 : i32
    %c0_i32_0 = arith.constant 0 : i32
    return %arg0, %c0_i32 : i32, i32
  }
  func.func @transform_1(%arg0: i32) -> (i32, i32) {
    %c0_i32 = arith.constant 0 : i32
    %c0_i32_0 = arith.constant 0 : i32
    %c0_i32_1 = arith.constant 0 : i32
    return %c0_i32, %c0_i32_0 : i32, i32
  }
  func.func @transform_2(%arg0: i32) -> (i32, i32) {
    %c0_i32 = arith.constant 0 : i32
    %c0_i32_0 = arith.constant 0 : i32
    %c0_i32_1 = arith.constant 0 : i32
    return %c0_i32, %c0_i32_0 : i32, i32
  }
  func.func @transform_3(%arg0: i32) -> (i32, i32) {
    %c0_i32 = arith.constant 0 : i32
    %c0_i32_0 = arith.constant 0 : i32
    %c0_i32_1 = arith.constant 0 : i32
    return %c0_i32, %c0_i32_0 : i32, i32
  }
  func.func @transform_4(%arg0: i32) -> (i32, i32) {
    %c0_i32 = arith.constant 0 : i32
    %c0_i32_0 = arith.constant 0 : i32
    %c0_i32_1 = arith.constant 0 : i32
    return %c0_i32, %c0_i32_0 : i32, i32
  }
  func.func @transform_5(%arg0: i32) -> (i32, i32) {
    %c0_i32 = arith.constant 0 : i32
    %c0_i32_0 = arith.constant 0 : i32
    %c0_i32_1 = arith.constant 0 : i32
    return %c0_i32, %c0_i32_0 : i32, i32
  }
  func.func @transform_6(%arg0: i32) -> (i32, i32) {
    %c0_i32 = arith.constant 0 : i32
    %c0_i32_0 = arith.constant 0 : i32
    %c0_i32_1 = arith.constant 0 : i32
    return %c0_i32, %c0_i32_0 : i32, i32
  }
  func.func @transform_7(%arg0: i32) -> (i32, i32) {
    %c0_i32 = arith.constant 0 : i32
    %c0_i32_0 = arith.constant 0 : i32
    %c0_i32_1 = arith.constant 0 : i32
    return %c0_i32, %c0_i32_0 : i32, i32
  }
  func.func @transform_8(%arg0: i32) -> (i32, i32) {
    %c0_i32 = arith.constant 0 : i32
    %c0_i32_0 = arith.constant 0 : i32
    %c0_i32_1 = arith.constant 0 : i32
    return %c0_i32, %c0_i32_0 : i32, i32
  }
  func.func @transform_9(%arg0: i32) -> (i32, i32) {
    %c0_i32 = arith.constant 0 : i32
    %c0_i32_0 = arith.constant 0 : i32
    %c0_i32_1 = arith.constant 0 : i32
    return %c0_i32, %c0_i32_0 : i32, i32
  }
  func.func @transform_10(%arg0: i32) -> (i32, i32) {
    %c0_i32 = arith.constant 0 : i32
    %c0_i32_0 = arith.constant 0 : i32
    %c0_i32_1 = arith.constant 0 : i32
    return %c0_i32, %c0_i32_0 : i32, i32
  }
  func.func @transform_11(%arg0: i32) -> (i32, i32) {
    %c0_i32 = arith.constant 0 : i32
    %c0_i32_0 = arith.constant 0 : i32
    return %arg0, %c0_i32 : i32, i32
  }
  func.func @transform_12(%arg0: i32) -> (i32, i32) {
    %c0_i32 = arith.constant 0 : i32
    %c0_i32_0 = arith.constant 0 : i32
    return %arg0, %c0_i32 : i32, i32
  }
}

</mosaic_0001>

<bundles_post_ra>
// kernel: tpu_custom_call.1
= control target key start
LH: loop header
LB: loop body
LE: loop exit
PB: predicated region body
PF: predicated region fallthrough
CT: control target
= control target key end

     0   :  { %s684_s0 = inlined_call_operand.vmem [shape: f32[8,3], index: 0, kind: input, shape index: {}]   ;;  %s685_s1 = inlined_call_operand.vmem [shape: f32[3,64], index: 1, kind: input, shape index: {}]   ;;  %s686_s2 = inlined_call_operand.vmem [shape: f32[1,64], index: 2, kind: input, shape index: {}]   ;;  %s687_s3 = inlined_call_operand.hbm [shape: f32[64,128], index: 3, kind: input, shape index: {}]   ;;  %s688_s4 = inlined_call_operand.vmem [shape: f32[1,128], index: 4, kind: input, shape index: {}]   ;;  %s689_s5 = inlined_call_operand.hbm [shape: f32[128,256], index: 5, kind: input, shape index: {}]   ;;  %s690_s6 = inlined_call_operand.vmem [shape: f32[1,256], index: 6, kind: input, shape index: {}]   ;;  %s691_s7 = inlined_call_operand.vmem [shape: f32[1,256], index: 7, kind: input, shape index: {}]   ;;  %s692_s8 = inlined_call_operand.<no memory space> [shape: f32[1,1], index: 8, kind: input, shape index: {}]   ;;  %s693_s9 = inlined_call_operand.vmem [shape: f32[1,256], index: 9, kind: input, shape index: {}]   ;;  %s694_s11 = inlined_call_operand.vmem [shape: f32[8,1], index: 11, kind: output, shape index: {0}]   ;;  %s695_s12 = inlined_call_operand.vmem [shape: f32[8,1], index: 12, kind: output, shape index: {1}]   ;;  %s696_s10 = inlined_call_operand.<no memory space> [shape: f32[1,1], index: 10, kind: input, shape index: {}]  }
   0x1   :  { %v18_v0 = vstv %s692_s8  ;;  %v20_v1 = vstv %s696_s10 }
   0x2   :  { %19 = vst [vmem:[#allocation2] sm:$0x1] %v18_v0  ;;  %21 = vst [vmem:[#allocation3] sm:$0x1] %v20_v1 }
   0x3   :  { %22 = vsyncpa [#allocation5], 0 }
   0x4   :  { %23 = vsyncpa [#allocation7], 0  ;;  %s548_s25 = smov [#allocation4]   ;;  %s500_s29 = scalar_lea.hbm %s687_s3, 1024 }
   0x5   :  { %s35_s26 = sshll.u32 %s548_s25, 4  ;;  %p501_p0 = scmp.ne.s32.totalorder %s687_s3, %s500_s29  ;;  %s36_s26 = int_to_ptr.vmem [resolvable:$true] %s35_s26 }
   0x6   :  { %p504_p1 = scmp.lt.u32.totalorder %s500_s29, %s687_s3 }
   0x8   :  { %p506_p2 = pnand %p504_p1, %p501_p0 }
   0xa   :  { %509 = shalt.err (!%p506_p2)
}
   0xb   :  { %s510_s10 = scalar_lea.vmem %s36_s26, 1024  ;;  %p515_p4 = scmp.lt.s32.totalorder %s36_s26, %s36_s26 }
   0xc   :  { %p511_p3 = scmp.ne.s32.totalorder %s36_s26, %s510_s10  ;;  %p516_p5 = scmp.lt.s32.totalorder %s510_s10, %s510_s10 }
   0xe   :  { %p517_p6 = por %p516_p5, %p515_p4 }
  0x10   :  { %p518_p7 = pnand %p517_p6, %p511_p3 }
  0x12   :  { %521 = shalt.err (!%p518_p7)
}
  0x13   :  { %s549_s15 = smov 128   ;;  %s550_s16 = smov 8  }
  0x14   :  { %41 = dma.hbm_to_vmem [thread:$0]  %s687_s3, 1024, %s36_s26, [#allocation5], %s549_s15, %s549_s15, %s550_s16  }
  0x15   :  { %s551_s19 = smov [#allocation6]   ;;  %s522_s23 = scalar_lea.hbm %s689_s5, 4096 }
  0x16   :  { %s49_s20 = sshll.u32 %s551_s19, 4  ;;  %p523_p8 = scmp.ne.s32.totalorder %s689_s5, %s522_s23  ;;  %s50_s20 = int_to_ptr.vmem [resolvable:$true] %s49_s20 }
  0x17   :  { %p526_p9 = scmp.lt.u32.totalorder %s522_s23, %s689_s5 }
  0x19   :  { %p528_p10 = pnand %p526_p9, %p523_p8 }
  0x1b   :  { %531 = shalt.err (!%p528_p10)
}
  0x1c   :  { %s532_s29 = scalar_lea.vmem %s50_s20, 4096  ;;  %p537_p12 = scmp.lt.s32.totalorder %s50_s20, %s50_s20 }
  0x1d   :  { %p533_p11 = scmp.ne.s32.totalorder %s50_s20, %s532_s29  ;;  %p538_p13 = scmp.lt.s32.totalorder %s532_s29, %s532_s29 }
  0x1f   :  { %p539_p0 = por %p538_p13, %p537_p12 }
  0x21   :  { %p540_p1 = pnand %p539_p0, %p533_p11 }
  0x23   :  { %543 = shalt.err (!%p540_p1)
}
  0x24   :  { %s552_s3 = smov 256   ;;  %s553_s26 = smov 16  }
  0x25   :  { %55 = dma.hbm_to_vmem [thread:$0]  %s689_s5, 4096, %s50_s20, [#allocation7], %s552_s3, %s552_s3, %s553_s26  }
  0x26   :  { %544 = dma.done.wait [#allocation5], 1024  }
  0x27   :  { %545 = vsyncadd [#allocation5], 4294966272 }
  0x28   :  { %546 = dma.done.wait [#allocation7], 4096  }
  0x29   :  { %547 = vsyncadd [#allocation7], 4294963200  ;;  %v554_v2 = vmov 0   ;;  %v555_v3 = vmov 2   ;;  %v556_v4 = vmov 0.0|0.0   ;;  %v72_v5 = vld [vmem:[%s684_s0] sm:$0xff]  ;;  %v79_v62 = vlaneseq }
  0x2a   :  { %490 = vset.pattern.permute.xlu0 %v554_v2  ;;  %492 = vset.pattern.permute.xlu1 %v555_v3  ;;  %v113_v6 = vld [vmem:[#allocation4] sm:$0xff]  ;;  %v114_v7 = vld [vmem:[#allocation4 + $0x8] sm:$0xff]  ;;  %v115_v8 = vld [vmem:[#allocation4 + $0x10] sm:$0xff]  ;;  %v557_v12 = vmov 1   ;;  %vm558_vm0 = vmmov 0   ;;  %v559_v19 = vmov 0.0  }
  0x2b   :  { %434 = vmatprep.subr.bf16.mxu0 %v556_v4  ;;  %76 = vperm.xlu0 %490, %v72_v5   ;;  %v116_v9 = vld [vmem:[#allocation4 + $0x18] sm:$0xff]  ;;  %v435_v10 = vpack.c.bf16 %v114_v7, %v113_v6  ;;  %v117_v13 = vld [vmem:[#allocation4 + $0x20] sm:$0xff]  ;;  %v118_v14 = vld [vmem:[#allocation4 + $0x28] sm:$0xff]  ;;  %v80_v63 = vshrl.u32 %v79_v62, 7  ;;  %vm128_vm1 = vcmask 523264   ;;  %vm372_vm2 = vcmask 7168  }
  0x2c   :  { %95 = vperm.xlu1 %492, %v72_v5   ;;  %v438_v11 = vpack.c.bf16 %v116_v9, %v115_v8  ;;  %v441_v15 = vpack.c.bf16 %v118_v14, %v117_v13  ;;  %v119_v16 = vld [vmem:[#allocation4 + $0x30] sm:$0xff]  ;;  %v120_v17 = vld [vmem:[#allocation4 + $0x38] sm:$0xff]  ;;  %431 = vmatprep.mubr.msk.f32.mxu0 %vm558_vm0, %v559_v19  ;;  %v204_v20 = vld [vmem:[#allocation6 + $0x8] sm:$0xff] }
  0x2d   :  { %436 = vmatpush3.bf16.msra.mxu0 %v435_v10  ;;  %v444_v18 = vpack.c.bf16 %v120_v17, %v119_v16  ;;  %311 = vmatprep.mubr.f32.mxu1 %v559_v19  ;;  %v206_v21 = vld [vmem:[#allocation6 + $0x18] sm:$0xff]  ;;  %v203_v22 = vld [vmem:[#allocation6] sm:$0xff]  ;;  %v205_v24 = vld [vmem:[#allocation6 + $0x10] sm:$0xff]  ;;  %v81_v0 = vsub.s32 0, %v80_v63  ;;  %v90_v1 = vsub.s32 1, %v80_v63  ;;  %v100_v2 = vsub.s32 2, %v80_v63 }
  0x2e   :  { %437 = vmatprep.subr.bf16.mxu0 %v556_v4  ;;  %v446_v23 = vpack.c.bf16 %v206_v21, %v204_v20  ;;  %v208_v25 = vld [vmem:[#allocation6 + $0x28] sm:$0xff]  ;;  %v210_v26 = vld [vmem:[#allocation6 + $0x38] sm:$0xff]  ;;  %v448_v27 = vpack.c.bf16 %v205_v24, %v203_v22  ;;  %v207_v29 = vld [vmem:[#allocation6 + $0x20] sm:$0xff] }
  0x2f   :  { %491 = vset.pattern.permute.xlu0 %v557_v12  ;;  %v450_v28 = vpack.c.bf16 %v210_v26, %v208_v25  ;;  %v209_v30 = vld [vmem:[#allocation6 + $0x30] sm:$0xff]  ;;  %v212_v31 = vld [vmem:[#allocation6 + $0x48] sm:$0xff]  ;;  %v214_v32 = vld [vmem:[#allocation6 + $0x58] sm:$0xff] }
  0x30   :  { %85 = vperm.xlu0 %491, %v72_v5   ;;  %447 = vmatprep.subr.bf16.mxu1 %v446_v23  ;;  %v452_v33 = vpack.c.bf16 %v209_v30, %v207_v29  ;;  %v454_v34 = vpack.c.bf16 %v214_v32, %v212_v31  ;;  %v211_v35 = vld [vmem:[#allocation6 + $0x40] sm:$0xff]  ;;  %v213_v36 = vld [vmem:[#allocation6 + $0x50] sm:$0xff]  ;;  %v216_v37 = vld [vmem:[#allocation6 + $0x68] sm:$0xff] }
  0x31   :  { %439 = vmatpush3.bf16.msra.mxu0 %v438_v11  ;;  %449 = vmatpush1.bf16.msra.mxu1 %v448_v27  ;;  %v218_v38 = vld [vmem:[#allocation6 + $0x78] sm:$0xff]  ;;  %v456_v39 = vpack.c.bf16 %v213_v36, %v211_v35  ;;  %v215_v41 = vld [vmem:[#allocation6 + $0x60] sm:$0xff]  ;;  %v217_v42 = vld [vmem:[#allocation6 + $0x70] sm:$0xff] }
  0x32   :  { %440 = vmatprep.subr.bf16.mxu0 %v556_v4  ;;  %451 = vmatprep.subr.bf16.mxu1 %v450_v28  ;;  %v458_v40 = vpack.c.bf16 %v218_v38, %v216_v37  ;;  %v220_v43 = vld [vmem:[#allocation6 + $0x88] sm:$0xff]  ;;  %v222_v44 = vld [vmem:[#allocation6 + $0x98] sm:$0xff]  ;;  %v460_v45 = vpack.c.bf16 %v217_v42, %v215_v41  ;;  %v219_v47 = vld [vmem:[#allocation6 + $0x80] sm:$0xff] }
  0x33   :  { %v462_v46 = vpack.c.bf16 %v222_v44, %v220_v43  ;;  %v221_v48 = vld [vmem:[#allocation6 + $0x90] sm:$0xff]  ;;  %v224_v49 = vld [vmem:[#allocation6 + $0xa8] sm:$0xff]  ;;  %v226_v50 = vld [vmem:[#allocation6 + $0xb8] sm:$0xff] }
  0x34   :  { %493 = vset.pattern.permute.xlu0 %v555_v3  ;;  %v464_v51 = vpack.c.bf16 %v221_v48, %v219_v47  ;;  %v466_v52 = vpack.c.bf16 %v226_v50, %v224_v49  ;;  %v223_v53 = vld [vmem:[#allocation6 + $0xa0] sm:$0xff]  ;;  %v225_v54 = vld [vmem:[#allocation6 + $0xb0] sm:$0xff]  ;;  %v228_v55 = vld [vmem:[#allocation6 + $0xc8] sm:$0xff] }
  0x35   :  { %442 = vmatpush3.bf16.msra.mxu0 %v441_v15  ;;  %453 = vmatpush1.bf16.msra.mxu1 %v452_v33  ;;  %v230_v56 = vld [vmem:[#allocation6 + $0xd8] sm:$0xff]  ;;  %v468_v57 = vpack.c.bf16 %v225_v54, %v223_v53  ;;  %v227_v59 = vld [vmem:[#allocation6 + $0xc0] sm:$0xff]  ;;  %v229_v60 = vld [vmem:[#allocation6 + $0xd0] sm:$0xff] }
  0x36   :  { %443 = vmatprep.subr.bf16.mxu0 %v556_v4  ;;  %455 = vmatprep.subr.bf16.mxu1 %v454_v34  ;;  %v470_v58 = vpack.c.bf16 %v230_v56, %v228_v55  ;;  %v472_v61 = vpack.c.bf16 %v229_v60, %v227_v59  ;;  %v73_v3 = vld [vmem:[%s685_s1] sm:$0x7]  ;;  %v233_v22 = vld [vmem:[#allocation6 + $0xf0] sm:$0xff] }
  0x37   :  { %v82_v5 = vrot.slane %v73_v3, %v81_v0  ;;  %v91_v6 = vrot.slane %v73_v3, %v90_v1  ;;  %v101_v7 = vrot.slane %v73_v3, %v100_v2  ;;  %v401_v14 = vld [vmem:[%s686_s2] ss:$0 sm:$0xff]  ;;  %v231_v21 = vld [vmem:[#allocation6 + $0xe0] sm:$0xff]  ;;  %v405_v50 = vld [vmem:[#allocation3] ss:$0 sm:$0xff] }
  0x38   :  { %v234_v19 = vld [vmem:[#allocation6 + $0xf8] sm:$0xff]  ;;  %v476_v23 = vpack.c.bf16 %v233_v22, %v231_v21 }
  0x39   :  { %445 = vmatpush3.bf16.msra.mxu0 %v444_v18  ;;  %457 = vmatpush1.bf16.msra.mxu1 %v456_v39  ;;  %v232_v18 = vld [vmem:[#allocation6 + $0xe8] sm:$0xff]  ;;  %v402_v24 = vld [vmem:[%s688_s4] ss:$0 sm:$0xff] }
  0x3a   :  { %459 = vmatprep.subr.bf16.mxu1 %v458_v40  ;;  %v474_v20 = vpack.c.bf16 %v234_v19, %v232_v18  ;;  %v235_v29 = vld [vmem:[%s690_s6] sm:$0x3] }
  0x3b   :  { %v240_v30 = vrot.slane %v235_v29, %v81_v0  ;;  %v320_v31 = vld [vmem:[%s691_s7] sm:$0x3]  ;;  %v244_v33 = vrot.slane %v235_v29, %v90_v1 }
  0x3c   :  { %v345_v32 = vld [vmem:[%s693_s9] sm:$0x3]  ;;  %v325_v36 = vrot.slane %v320_v31, %v81_v0  ;;  %v329_v40 = vrot.slane %v320_v31, %v90_v1 }
  0x3d   :  { %461 = vmatpush1.bf16.msra.mxu1 %v460_v45  ;;  %v350_v37 = vrot.slane %v345_v32, %v81_v0  ;;  %v354_v41 = vrot.slane %v345_v32, %v90_v1 }
  0x3e   :  { %463 = vmatprep.subr.bf16.mxu1 %v462_v46 }
  0x41   :  { %465 = vmatpush1.bf16.msra.mxu1 %v464_v51  ;;  %v404_v51 = vld [vmem:[#allocation2] ss:$0 sm:$0xff] }
  0x42   :  { %467 = vmatprep.subr.bf16.mxu1 %v466_v52 }
  0x45   :  { %469 = vmatpush1.bf16.msra.mxu1 %v468_v57 }
  0x46   :  { %471 = vmatprep.subr.bf16.mxu1 %v470_v58 }
  0x49   :  { %473 = vmatpush1.bf16.msra.mxu1 %v472_v61 }
  0x4a   :  { %475 = vmatprep.subr.bf16.mxu1 %v474_v20 }
  0x4d   :  { %477 = vmatpush1.bf16.msra.mxu1 %v476_v23 }
  0xaa   :  { %v77_v4 = vpop.permute.xlu0 %76 }
  0xab   :  { %v96_v8 = vpop.permute.xlu1 %95  ;;  %v83_v10 = vmul.f32 %v82_v5, %v77_v4 }
  0xac   :  { %v102_v12 = vmul.f32 %v101_v7, %v96_v8 }
  0xaf   :  { %v86_v9 = vpop.permute.xlu0 %85 }
  0xb0   :  { %v92_v11 = vmul.f32 %v91_v6, %v86_v9 }
  0xb2   :  { %v93_v13 = vadd.f32 %v92_v11, %v83_v10 }
  0xb4   :  { %v103_v15 = vadd.f32 %v102_v12, %v93_v13 }
  0xb6   :  { %v111_v16 = vadd.f32 %v401_v14, %v103_v15 }
  0xb8   :  { %v112_v17 = vmax.f32 %v111_v16, 0.0 }
  0xba   :  { %432 = vmatmul.mubr.msk.f32.vlgmr.msra.gmra.mrb[0].mxu0 %vm128_vm1, %v112_v17 }
 0x18d   :  { %v198_v25 = vpop.f32.mrb[0].mxu0 }
 0x18e   :  { %v199_v26 = vadd.f32 %v402_v24, %v198_v25  ;;  %v433_v27 = vpop.f32.mrb[1].mxu0 }
 0x190   :  { %v202_v28 = vmax.f32 %v199_v26, 0.0 }
 0x192   :  { %312 = vmatmul.mubr.f32.vlgmr.msra.gmra.mrb[0].mxu1 %v202_v28 }
 0x265   :  { %v313_v34 = vpop.f32.mrb[0].mxu1 }
 0x266   :  { %v314_v35 = vadd.f32 %v313_v34, %v240_v30  ;;  %v315_v38 = vpop.f32.mrb[1].mxu1 }
 0x267   :  { %v316_v39 = vadd.f32 %v315_v38, %v244_v33 }
 0x268   :  { %v318_v42 = vmax.f32 %v314_v35, 0.0 }
 0x269   :  { %v319_v43 = vmax.f32 %v316_v39, 0.0 }
 0x26a   :  { %v332_v44 = vmul.f32 %v325_v36, %v318_v42  ;;  %v357_v45 = vmul.f32 %v350_v37, %v318_v42 }
 0x26b   :  { %v333_v46 = vmul.f32 %v329_v40, %v319_v43  ;;  %v358_v47 = vmul.f32 %v354_v41, %v319_v43 }
 0x26d   :  { %v359_v48 = vadd.f32 %v358_v47, %v357_v45  ;;  %v334_v49 = vadd.f32 %v333_v46, %v332_v44 }
 0x26f   :  { %360 = vadd.xlane.f32.xlu1 %v359_v48  ;;  %335 = vadd.xlane.f32.xlu0 %v334_v49 }
 0x2fc   :  { %v361_v52 = vpop.xlane.xlu1 %360  ;;  %v336_v53 = vpop.xlane.xlu0 %335 }
 0x2fd   :  { %v369_v54 = vadd.f32 %v405_v50, %v361_v52  ;;  %v344_v55 = vadd.f32 %v404_v51, %v336_v53 }
 0x2ff   :  { %v375_v56 = vand.u32 2147483647, %v369_v54  ;;  %494 = vtanh.f32 %v344_v55  ;;  %v374_v5 = vmax.f32 %v369_v54, 0.0 }
 0x301   :  { %v376_v57 = vsub.f32 0.0, %v375_v56 }
 0x303   :  { %v377_v58 = vmul.f32 1.442695, %v376_v57 }
 0x305   :  { %496 = vpow2.f32 %v377_v58 }
 0x309   :  { %v495_v59 = vpop.eup %494 }
 0x30a   :  { %v371_v60 = vmul.f32 2.0, %v495_v59 }
 0x30c   :  { %373 = vst.msk [vmem:[%s694_s11] sm:$0xff] %vm372_vm2, %v371_v60 }
 0x30f   :  { %v497_v61 = vpop.eup %496 }
 0x310   :  { %v379_v62 = vadd.f32 1.0, %v497_v61  ;;  %v382_v63 = vmul.f32 -0.5, %v497_v61  ;;  %v385_v1 = vand.u32 2147483647, %v497_v61 }
 0x312   :  { %498 = vlog2.f32 %v379_v62  ;;  %v383_v0 = vadd.f32 1.0, %v382_v63  ;;  %vm386_vm3 = vcmp.lt.f32.partialorder %v385_v1, 0.0004427343 }
 0x314   :  { %v384_v4 = vmul.f32 %v497_v61, %v383_v0 }
 0x31c   :  { %v499_v2 = vpop.eup %498 }
 0x31d   :  { %v381_v3 = vmul.f32 0.6931472, %v499_v2 }
 0x31f   :  { %v387_v6 = vsel %vm386_vm3, %v384_v4, %v381_v3 }
 0x320   :  { %v388_v7 = vadd.f32 %v387_v6, %v374_v5 }
 0x322   :  { %v389_v8 = vadd.f32 0.001, %v388_v7 }
 0x324   :  { %390 = vst.msk [vmem:[%s695_s12] sm:$0xff] %vm372_vm2, %v389_v8 }
 0x325   :  { %399 = vsyncpa [#allocation5], 1 }
 0x326   :  { %400 = vsyncpa [#allocation7], 1 }

</bundles_post_ra>
